<compile_context>
chip_gen: v5e
topology: v5e:2x2
jax: 0.10.0
libtpu: 0.0.40
codegen_flags: <defaults>
</compile_context>

<pallas_src>
import functools

import jax
import jax.numpy as jnp
from jax import lax
from jax.experimental import pallas as pl
from jax.experimental.pallas import tpu as pltpu


# ----------------------------- Pallas kernels ------------------------------

def _fused_conv_stats_kernel(x_ref, w_ref, y_ref, stats_ref, acc_ref, *,
                             K, p, Hp, Wp, Nb):
    """ReLU + effective KxK conv + BN partial sums for Nb images.

    x_ref:     (Nb, Cin, Lp)        zero-padded input, flattened with row stride Wp
    w_ref:     (K*K, Cout, Cin)     folded conv taps, tap index t = kh*K + kw
    y_ref:     (Nb, Cout, Hout*Wo)  pre-BN output incl. zero H-pad rows (lane-dense)
    stats_ref: (Nb, Cout, 2)        per-image [sum, sum_of_squares] of pre-BN output
    acc_ref:   (Cout, Ho*Wp)        VMEM scratch (wide accumulator, stride Wp)
    """
    Ho = Hp - K + 1
    Wo = Wp - K + 1
    Cout = w_ref.shape[1]
    f32 = jnp.float32

    for n in range(Nb):                                   # static unroll
        # ---- K*K accumulated small dots (no lane-misaligned im2col concat) ----
        acc = jnp.zeros((Cout, Ho * Wp), f32)
        for kh in range(K):
            for kw in range(K):
                s = kh * Wp + kw
                slab = jnp.maximum(                        # ReLU fused on load
                    x_ref[n, :, s:s + Ho * Wp].astype(f32), 0.0)
                acc = acc + jnp.dot(w_ref[kh * K + kw].astype(f32), slab,
                                    preferred_element_type=f32)
        acc_ref[...] = acc

        # ---- drop the K-1 garbage cols per row (stride Wp -> Wo), add the 2nd
        #      conv's zero H-pad rows, emit ONE lane-dense (Cout, Hout*Wo) store ----
        pieces = [acc_ref[:, h * Wp:h * Wp + Wo] for h in range(Ho)]
        if p > 0:
            zrow = jnp.zeros((Cout, p * Wo), f32)
            pieces = [zrow] + pieces + [zrow]
        yflat = jnp.concatenate(pieces, axis=1)            # (Cout, Hout*Wo)
        y_ref[n] = yflat.astype(y_ref.dtype)

        # ---- per-image BN partial sums (zero pad rows contribute nothing) ----
        s1 = jnp.sum(yflat, axis=1, keepdims=True)         # (Cout, 1)
        s2 = jnp.sum(yflat * yflat, axis=1, keepdims=True)
        stats_ref[n] = jnp.concatenate([s1, s2], axis=1)   # (Cout, 2)


def _bn_apply_kernel(y_ref, scale_ref, shift_ref, o_ref):
    """In-place BN affine: o = y * scale + shift (o aliases y; pad rows -> shift)."""
    o_ref[...] = (y_ref[...] * scale_ref[...] + shift_ref[...]).astype(o_ref.dtype)


# --------------------------- sizing heuristics ------------------------------

def _pick_vmem_limit_bytes():
    """v5e/v6e have 128 MiB physical VMEM, v7x has 64 MiB; keep ~half as scoped."""
    try:
        cap = pltpu.get_tpu_info().vmem_capacity_bytes
    except Exception:
        cap = None
    if not cap:
        return 32 * 1024 * 1024
    return int(min(96 * 1024 * 1024, max(32 * 1024 * 1024, cap // 2)))


def _pick_batch_block(n_batch, per_image_bytes, budget_bytes):
    """Largest divisor of N that fits the budget while keeping >=2 grid steps."""
    best = 1
    for nb in range(1, n_batch + 1):
        if n_batch % nb:
            continue
        if n_batch >= 2 and (n_batch // nb) < 2:
            continue                           # v7x: 2 TensorCores share the grid
        if nb * per_image_bytes > budget_bytes:
            continue
        best = nb
    return best


# ------------------------------ JAX wrapper --------------------------------

def fac_conv_forward(x_nchw, w1_oihw, w2_oihw, gamma, beta, *, kernel_length,
                     stride, padding, eps=1e-5):
    """FacConv forward.  x_nchw: (N, Cin, H, W) float32.
    w1_oihw: (Cmid, Cin, K, 1), w2_oihw: (Cout, Cmid, 1, K)  (PyTorch OIHW)."""
    assert stride == 1  # TODO(synk): strided variant not implemented
    K, p = kernel_length, padding
    N, Cin, H, W = x_nchw.shape
    Cout = w2_oihw.shape[0]

    # Folded padding: pad H by p and W by 2p, run one valid KxK conv; the 2nd
    # conv's extra H-pad rows are exactly zero pre-BN and are added on store.
    Hp, Wp = H + 2 * p, W + 4 * p
    Ho, Wo = Hp - K + 1, Wp - K + 1          # valid conv output (interior rows)
    Hout, Wout = Ho + 2 * p, Wo              # final output size
    Lp = (Hp + 1) * Wp                       # +1 zero row so flat taps never run OOB

    # ---- fold the two 1-D convs into one effective KxK conv (tiny Cmid) ----
    w1 = w1_oihw[..., 0].astype(jnp.float32)           # (Cmid, Cin, K)
    w2 = w2_oihw[:, :, 0, :].astype(jnp.float32)       # (Cout, Cmid, K)
    w_eff = jnp.einsum('omw,mih->oihw', w2, w1)        # (Cout, Cin, K, K)
    w_taps = jnp.transpose(w_eff, (2, 3, 0, 1)).reshape(K * K, Cout, Cin)

    # ---- single small NCHW zero-pad; the flat reshape is a free bitcast ----
    xpad = jnp.pad(x_nchw.astype(jnp.float32),
                   ((0, 0), (0, 0), (p, p + 1), (2 * p, 2 * p)))
    x_flat = xpad.reshape(N, Cin, Lp)

    vmem_limit = _pick_vmem_limit_bytes()
    per_img = 4 * (Cin * Lp + Cout * Hout * Wout + 2 * Cout) * 2   # double-buffered
    Nb = _pick_batch_block(N, per_img, vmem_limit // 4)

    cparams = pltpu.CompilerParams(
        dimension_semantics=("parallel",),     # shard batch blocks across v7x cores
        vmem_limit_bytes=vmem_limit,
    )

    # ---- pass 1: ReLU + conv + BN partial stats, written in final layout ----
    y_pre, stats = pl.pallas_call(
        functools.partial(_fused_conv_stats_kernel, K=K, p=p, Hp=Hp, Wp=Wp, Nb=Nb),
        grid=(N // Nb,),
        in_specs=[
            pl.BlockSpec((Nb, Cin, Lp), lambda i: (i, 0, 0)),
            pl.BlockSpec((K * K, Cout, Cin), lambda i: (0, 0, 0)),
        ],
        out_specs=(
            pl.BlockSpec((Nb, Cout, Hout * Wout), lambda i: (i, 0, 0)),
            pl.BlockSpec((Nb, Cout, 2), lambda i: (i, 0, 0)),
        ),
        out_shape=(
            jax.ShapeDtypeStruct((N, Cout, Hout * Wout), jnp.float32),
            jax.ShapeDtypeStruct((N, Cout, 2), jnp.float32),
        ),
        scratch_shapes=[pltpu.VMEM((Cout, Ho * Wp), jnp.float32)],
        compiler_params=cparams,
    )(x_flat, w_taps)

    # ---- BN finalize: tiny (Cout, 2) math in plain JAX ----
    totals = jnp.sum(stats, axis=0)                           # (Cout, 2)
    count = float(N * Hout * Wout)                            # pad rows count too
    mean = totals[:, 0] / count
    var = jnp.maximum(totals[:, 1] / count - mean * mean, 0.0)  # biased variance
    scale = gamma.astype(jnp.float32) * lax.rsqrt(var + eps)
    shift = beta.astype(jnp.float32) - mean * scale
    scale3 = scale.reshape(1, Cout, 1)
    shift3 = shift.reshape(1, Cout, 1)

    # ---- pass 2: in-place BN affine over the whole buffer (zeros -> shift) ----
    out_flat = pl.pallas_call(
        _bn_apply_kernel,
        grid=(N // Nb,),
        in_specs=[
            pl.BlockSpec((Nb, Cout, Hout * Wout), lambda i: (i, 0, 0)),
            pl.BlockSpec((1, Cout, 1), lambda i: (0, 0, 0)),
            pl.BlockSpec((1, Cout, 1), lambda i: (0, 0, 0)),
        ],
        out_specs=pl.BlockSpec((Nb, Cout, Hout * Wout), lambda i: (i, 0, 0)),
        out_shape=jax.ShapeDtypeStruct((N, Cout, Hout * Wout), jnp.float32),
        input_output_aliases={0: 0},
        compiler_params=cparams,
    )(y_pre, scale3, shift3)

    # Free reshape: the buffer is already channel-major NCHW.
    return out_flat.reshape(N, Cout, Hout, Wout)


# ------------------------- pure-JAX reference check ------------------------

def fac_conv_reference(x, w1, w2, gamma, beta, *, padding):
    p = padding
    y = jnp.maximum(x, 0.0)
    y = lax.conv_general_dilated(y, w1, (1, 1), [(p, p), (p, p)],
                                 dimension_numbers=("NCHW", "OIHW", "NCHW"))
    y = lax.conv_general_dilated(y, w2, (1, 1), [(p, p), (p, p)],
                                 dimension_numbers=("NCHW", "OIHW", "NCHW"))
    mean = jnp.mean(y, axis=(0, 2, 3), keepdims=True)
    var = jnp.mean((y - mean) ** 2, axis=(0, 2, 3), keepdims=True)
    yhat = (y - mean) * lax.rsqrt(var + 1e-5)
    return yhat * gamma.reshape(1, -1, 1, 1) + beta.reshape(1, -1, 1, 1)


# ---------------------------------- main -----------------------------------

if __name__ == "__main__":
    C_in, C_out, K, stride, padding = 4, 8, 3, 1, 1
    N, H, W = 2, 16, 16

    key = jax.random.PRNGKey(0)
    kx, k1, k2, kg, kb = jax.random.split(key, 5)
    x = jax.random.normal(kx, (N, C_in, H, W), jnp.float32)
    w1 = jax.random.normal(k1, (C_in, C_in, K, 1), jnp.float32) * 0.2   # OIHW
    w2 = jax.random.normal(k2, (C_out, C_in, 1, K), jnp.float32) * 0.2  # OIHW
    gamma = 1.0 + 0.1 * jax.random.normal(kg, (C_out,), jnp.float32)
    beta = 0.1 * jax.random.normal(kb, (C_out,), jnp.float32)

    fwd = jax.jit(functools.partial(fac_conv_forward, kernel_length=K,
                                    stride=stride, padding=padding))
    out = jax.block_until_ready(fwd(x, w1, w2, gamma, beta))

    ref = jax.block_until_ready(
        fac_conv_reference(x, w1, w2, gamma, beta, padding=padding))

    assert out.shape == ref.shape, (out.shape, ref.shape)
    max_err = float(jnp.max(jnp.abs(out - ref)))
    assert max_err < 1e-2, f"max abs error too large: {max_err}"

    print("KERNEL_OK")
</pallas_src>

<mosaic_0001>
module attributes {stable_mosaic.version = 11 : i64} {
  func.func @_fused_conv_stats_kernel(%arg0: i32, %arg1: memref<1x4x380xf32, #tpu.memory_space<vmem>>, %arg2: memref<9x8x4xf32, #tpu.memory_space<vmem>>, %arg3: memref<1x8x324xf32, #tpu.memory_space<vmem>>, %arg4: memref<1x8x2xf32, #tpu.memory_space<vmem>>, %arg5: memref<8x320xf32, #tpu.memory_space<vmem>>) attributes {dimension_semantics = [#tpu.dimension_semantics<parallel>], iteration_bounds = array<i64: 2>, scalar_prefetch = 0 : i64, scratch_operands = 1 : i64, tpu.core_type = #tpu.core_type<tc>, window_params = [{transform_indices = @transform_0, window_bounds = array<i64: 1, 4, 380>}, {pipeline_mode = #tpu.pipeline_mode<synchronous>, transform_indices = @transform_1, window_bounds = array<i64: 9, 8, 4>}, {transform_indices = @transform_2, window_bounds = array<i64: 1, 8, 324>}, {transform_indices = @transform_3, window_bounds = array<i64: 1, 8, 2>}]} {
    %cst = arith.constant 0.000000e+00 : f32
    %0 = vector.broadcast %cst : f32 to vector<8x320xf32>
    %c0 = arith.constant 0 : index
    %c0_0 = arith.constant 0 : index
    %c0_1 = arith.constant 0 : index
    %1 = vector.load %arg1[%c0, %c0_0, %c0_1] : memref<1x4x380xf32, #tpu.memory_space<vmem>>, vector<1x4x320xf32>
    %2 = vector.shape_cast %1 : vector<1x4x320xf32> to vector<4x320xf32>
    %cst_2 = arith.constant 0.000000e+00 : f32
    %3 = vector.broadcast %cst_2 : f32 to vector<4x320xf32>
    %4 = arith.maximumf %2, %3 : vector<4x320xf32>
    %c0_3 = arith.constant 0 : index
    %c0_4 = arith.constant 0 : index
    %c0_5 = arith.constant 0 : index
    %5 = vector.load %arg2[%c0_3, %c0_4, %c0_5] : memref<9x8x4xf32, #tpu.memory_space<vmem>>, vector<1x8x4xf32>
    %6 = vector.shape_cast %5 : vector<1x8x4xf32> to vector<8x4xf32>
    %cst_6 = arith.constant dense<0.000000e+00> : vector<8x320xf32>
    %7 = tpu.matmul %6, %4, %cst_6 {dimension_numbers = #tpu.dot_dimension_numbers<[1], [0], [0], [1], [0, 0, 1, 1], [], []>} : vector<8x4xf32>, vector<4x320xf32>, vector<8x320xf32> -> vector<8x320xf32>
    %8 = arith.addf %0, %7 : vector<8x320xf32>
    %c0_7 = arith.constant 0 : index
    %c0_8 = arith.constant 0 : index
    %c1 = arith.constant 1 : index
    %9 = vector.load %arg1[%c0_7, %c0_8, %c1] : memref<1x4x380xf32, #tpu.memory_space<vmem>>, vector<1x4x320xf32>
    %10 = vector.shape_cast %9 : vector<1x4x320xf32> to vector<4x320xf32>
    %cst_9 = arith.constant 0.000000e+00 : f32
    %11 = vector.broadcast %cst_9 : f32 to vector<4x320xf32>
    %12 = arith.maximumf %10, %11 : vector<4x320xf32>
    %c1_10 = arith.constant 1 : index
    %c0_11 = arith.constant 0 : index
    %c0_12 = arith.constant 0 : index
    %13 = vector.load %arg2[%c1_10, %c0_11, %c0_12] : memref<9x8x4xf32, #tpu.memory_space<vmem>>, vector<1x8x4xf32>
    %14 = vector.shape_cast %13 : vector<1x8x4xf32> to vector<8x4xf32>
    %cst_13 = arith.constant dense<0.000000e+00> : vector<8x320xf32>
    %15 = tpu.matmul %14, %12, %cst_13 {dimension_numbers = #tpu.dot_dimension_numbers<[1], [0], [0], [1], [0, 0, 1, 1], [], []>} : vector<8x4xf32>, vector<4x320xf32>, vector<8x320xf32> -> vector<8x320xf32>
    %16 = arith.addf %8, %15 : vector<8x320xf32>
    %c0_14 = arith.constant 0 : index
    %c0_15 = arith.constant 0 : index
    %c2 = arith.constant 2 : index
    %17 = vector.load %arg1[%c0_14, %c0_15, %c2] : memref<1x4x380xf32, #tpu.memory_space<vmem>>, vector<1x4x320xf32>
    %18 = vector.shape_cast %17 : vector<1x4x320xf32> to vector<4x320xf32>
    %cst_16 = arith.constant 0.000000e+00 : f32
    %19 = vector.broadcast %cst_16 : f32 to vector<4x320xf32>
    %20 = arith.maximumf %18, %19 : vector<4x320xf32>
    %c2_17 = arith.constant 2 : index
    %c0_18 = arith.constant 0 : index
    %c0_19 = arith.constant 0 : index
    %21 = vector.load %arg2[%c2_17, %c0_18, %c0_19] : memref<9x8x4xf32, #tpu.memory_space<vmem>>, vector<1x8x4xf32>
    %22 = vector.shape_cast %21 : vector<1x8x4xf32> to vector<8x4xf32>
    %cst_20 = arith.constant dense<0.000000e+00> : vector<8x320xf32>
    %23 = tpu.matmul %22, %20, %cst_20 {dimension_numbers = #tpu.dot_dimension_numbers<[1], [0], [0], [1], [0, 0, 1, 1], [], []>} : vector<8x4xf32>, vector<4x320xf32>, vector<8x320xf32> -> vector<8x320xf32>
    %24 = arith.addf %16, %23 : vector<8x320xf32>
    %c0_21 = arith.constant 0 : index
    %c0_22 = arith.constant 0 : index
    %c20 = arith.constant 20 : index
    %25 = vector.load %arg1[%c0_21, %c0_22, %c20] : memref<1x4x380xf32, #tpu.memory_space<vmem>>, vector<1x4x320xf32>
    %26 = vector.shape_cast %25 : vector<1x4x320xf32> to vector<4x320xf32>
    %cst_23 = arith.constant 0.000000e+00 : f32
    %27 = vector.broadcast %cst_23 : f32 to vector<4x320xf32>
    %28 = arith.maximumf %26, %27 : vector<4x320xf32>
    %c3 = arith.constant 3 : index
    %c0_24 = arith.constant 0 : index
    %c0_25 = arith.constant 0 : index
    %29 = vector.load %arg2[%c3, %c0_24, %c0_25] : memref<9x8x4xf32, #tpu.memory_space<vmem>>, vector<1x8x4xf32>
    %30 = vector.shape_cast %29 : vector<1x8x4xf32> to vector<8x4xf32>
    %cst_26 = arith.constant dense<0.000000e+00> : vector<8x320xf32>
    %31 = tpu.matmul %30, %28, %cst_26 {dimension_numbers = #tpu.dot_dimension_numbers<[1], [0], [0], [1], [0, 0, 1, 1], [], []>} : vector<8x4xf32>, vector<4x320xf32>, vector<8x320xf32> -> vector<8x320xf32>
    %32 = arith.addf %24, %31 : vector<8x320xf32>
    %c0_27 = arith.constant 0 : index
    %c0_28 = arith.constant 0 : index
    %c21 = arith.constant 21 : index
    %33 = vector.load %arg1[%c0_27, %c0_28, %c21] : memref<1x4x380xf32, #tpu.memory_space<vmem>>, vector<1x4x320xf32>
    %34 = vector.shape_cast %33 : vector<1x4x320xf32> to vector<4x320xf32>
    %cst_29 = arith.constant 0.000000e+00 : f32
    %35 = vector.broadcast %cst_29 : f32 to vector<4x320xf32>
    %36 = arith.maximumf %34, %35 : vector<4x320xf32>
    %c4 = arith.constant 4 : index
    %c0_30 = arith.constant 0 : index
    %c0_31 = arith.constant 0 : index
    %37 = vector.load %arg2[%c4, %c0_30, %c0_31] : memref<9x8x4xf32, #tpu.memory_space<vmem>>, vector<1x8x4xf32>
    %38 = vector.shape_cast %37 : vector<1x8x4xf32> to vector<8x4xf32>
    %cst_32 = arith.constant dense<0.000000e+00> : vector<8x320xf32>
    %39 = tpu.matmul %38, %36, %cst_32 {dimension_numbers = #tpu.dot_dimension_numbers<[1], [0], [0], [1], [0, 0, 1, 1], [], []>} : vector<8x4xf32>, vector<4x320xf32>, vector<8x320xf32> -> vector<8x320xf32>
    %40 = arith.addf %32, %39 : vector<8x320xf32>
    %c0_33 = arith.constant 0 : index
    %c0_34 = arith.constant 0 : index
    %c22 = arith.constant 22 : index
    %41 = vector.load %arg1[%c0_33, %c0_34, %c22] : memref<1x4x380xf32, #tpu.memory_space<vmem>>, vector<1x4x320xf32>
    %42 = vector.shape_cast %41 : vector<1x4x320xf32> to vector<4x320xf32>
    %cst_35 = arith.constant 0.000000e+00 : f32
    %43 = vector.broadcast %cst_35 : f32 to vector<4x320xf32>
    %44 = arith.maximumf %42, %43 : vector<4x320xf32>
    %c5 = arith.constant 5 : index
    %c0_36 = arith.constant 0 : index
    %c0_37 = arith.constant 0 : index
    %45 = vector.load %arg2[%c5, %c0_36, %c0_37] : memref<9x8x4xf32, #tpu.memory_space<vmem>>, vector<1x8x4xf32>
    %46 = vector.shape_cast %45 : vector<1x8x4xf32> to vector<8x4xf32>
    %cst_38 = arith.constant dense<0.000000e+00> : vector<8x320xf32>
    %47 = tpu.matmul %46, %44, %cst_38 {dimension_numbers = #tpu.dot_dimension_numbers<[1], [0], [0], [1], [0, 0, 1, 1], [], []>} : vector<8x4xf32>, vector<4x320xf32>, vector<8x320xf32> -> vector<8x320xf32>
    %48 = arith.addf %40, %47 : vector<8x320xf32>
    %c0_39 = arith.constant 0 : index
    %c0_40 = arith.constant 0 : index
    %c40 = arith.constant 40 : index
    %49 = vector.load %arg1[%c0_39, %c0_40, %c40] : memref<1x4x380xf32, #tpu.memory_space<vmem>>, vector<1x4x320xf32>
    %50 = vector.shape_cast %49 : vector<1x4x320xf32> to vector<4x320xf32>
    %cst_41 = arith.constant 0.000000e+00 : f32
    %51 = vector.broadcast %cst_41 : f32 to vector<4x320xf32>
    %52 = arith.maximumf %50, %51 : vector<4x320xf32>
    %c6 = arith.constant 6 : index
    %c0_42 = arith.constant 0 : index
    %c0_43 = arith.constant 0 : index
    %53 = vector.load %arg2[%c6, %c0_42, %c0_43] : memref<9x8x4xf32, #tpu.memory_space<vmem>>, vector<1x8x4xf32>
    %54 = vector.shape_cast %53 : vector<1x8x4xf32> to vector<8x4xf32>
    %cst_44 = arith.constant dense<0.000000e+00> : vector<8x320xf32>
    %55 = tpu.matmul %54, %52, %cst_44 {dimension_numbers = #tpu.dot_dimension_numbers<[1], [0], [0], [1], [0, 0, 1, 1], [], []>} : vector<8x4xf32>, vector<4x320xf32>, vector<8x320xf32> -> vector<8x320xf32>
    %56 = arith.addf %48, %55 : vector<8x320xf32>
    %c0_45 = arith.constant 0 : index
    %c0_46 = arith.constant 0 : index
    %c41 = arith.constant 41 : index
    %57 = vector.load %arg1[%c0_45, %c0_46, %c41] : memref<1x4x380xf32, #tpu.memory_space<vmem>>, vector<1x4x320xf32>
    %58 = vector.shape_cast %57 : vector<1x4x320xf32> to vector<4x320xf32>
    %cst_47 = arith.constant 0.000000e+00 : f32
    %59 = vector.broadcast %cst_47 : f32 to vector<4x320xf32>
    %60 = arith.maximumf %58, %59 : vector<4x320xf32>
    %c7 = arith.constant 7 : index
    %c0_48 = arith.constant 0 : index
    %c0_49 = arith.constant 0 : index
    %61 = vector.load %arg2[%c7, %c0_48, %c0_49] : memref<9x8x4xf32, #tpu.memory_space<vmem>>, vector<1x8x4xf32>
    %62 = vector.shape_cast %61 : vector<1x8x4xf32> to vector<8x4xf32>
    %cst_50 = arith.constant dense<0.000000e+00> : vector<8x320xf32>
    %63 = tpu.matmul %62, %60, %cst_50 {dimension_numbers = #tpu.dot_dimension_numbers<[1], [0], [0], [1], [0, 0, 1, 1], [], []>} : vector<8x4xf32>, vector<4x320xf32>, vector<8x320xf32> -> vector<8x320xf32>
    %64 = arith.addf %56, %63 : vector<8x320xf32>
    %c0_51 = arith.constant 0 : index
    %c0_52 = arith.constant 0 : index
    %c42 = arith.constant 42 : index
    %65 = vector.load %arg1[%c0_51, %c0_52, %c42] : memref<1x4x380xf32, #tpu.memory_space<vmem>>, vector<1x4x320xf32>
    %66 = vector.shape_cast %65 : vector<1x4x320xf32> to vector<4x320xf32>
    %cst_53 = arith.constant 0.000000e+00 : f32
    %67 = vector.broadcast %cst_53 : f32 to vector<4x320xf32>
    %68 = arith.maximumf %66, %67 : vector<4x320xf32>
    %c8 = arith.constant 8 : index
    %c0_54 = arith.constant 0 : index
    %c0_55 = arith.constant 0 : index
    %69 = vector.load %arg2[%c8, %c0_54, %c0_55] : memref<9x8x4xf32, #tpu.memory_space<vmem>>, vector<1x8x4xf32>
    %70 = vector.shape_cast %69 : vector<1x8x4xf32> to vector<8x4xf32>
    %cst_56 = arith.constant dense<0.000000e+00> : vector<8x320xf32>
    %71 = tpu.matmul %70, %68, %cst_56 {dimension_numbers = #tpu.dot_dimension_numbers<[1], [0], [0], [1], [0, 0, 1, 1], [], []>} : vector<8x4xf32>, vector<4x320xf32>, vector<8x320xf32> -> vector<8x320xf32>
    %72 = arith.addf %64, %71 : vector<8x320xf32>
    %c0_57 = arith.constant 0 : index
    %c0_58 = arith.constant 0 : index
    %73 = vector.load %arg5[%c0_57, %c0_58] : memref<8x320xf32, #tpu.memory_space<vmem>>, vector<8x320xf32>
    tpu.vector_store %arg5[%c0_57, %c0_58], %72 {strides = array<i32>} : memref<8x320xf32, #tpu.memory_space<vmem>>, vector<8x320xf32>,
    %c0_59 = arith.constant 0 : index
    %c0_60 = arith.constant 0 : index
    %74 = vector.load %arg5[%c0_59, %c0_60] : memref<8x320xf32, #tpu.memory_space<vmem>>, vector<8x18xf32>
    %c0_61 = arith.constant 0 : index
    %c20_62 = arith.constant 20 : index
    %75 = vector.load %arg5[%c0_61, %c20_62] : memref<8x320xf32, #tpu.memory_space<vmem>>, vector<8x18xf32>
    %c0_63 = arith.constant 0 : index
    %c40_64 = arith.constant 40 : index
    %76 = vector.load %arg5[%c0_63, %c40_64] : memref<8x320xf32, #tpu.memory_space<vmem>>, vector<8x18xf32>
    %c0_65 = arith.constant 0 : index
    %c60 = arith.constant 60 : index
    %77 = vector.load %arg5[%c0_65, %c60] : memref<8x320xf32, #tpu.memory_space<vmem>>, vector<8x18xf32>
    %c0_66 = arith.constant 0 : index
    %c80 = arith.constant 80 : index
    %78 = vector.load %arg5[%c0_66, %c80] : memref<8x320xf32, #tpu.memory_space<vmem>>, vector<8x18xf32>
    %c0_67 = arith.constant 0 : index
    %c100 = arith.constant 100 : index
    %79 = vector.load %arg5[%c0_67, %c100] : memref<8x320xf32, #tpu.memory_space<vmem>>, vector<8x18xf32>
    %c0_68 = arith.constant 0 : index
    %c120 = arith.constant 120 : index
    %80 = vector.load %arg5[%c0_68, %c120] : memref<8x320xf32, #tpu.memory_space<vmem>>, vector<8x18xf32>
    %c0_69 = arith.constant 0 : index
    %c140 = arith.constant 140 : index
    %81 = vector.load %arg5[%c0_69, %c140] : memref<8x320xf32, #tpu.memory_space<vmem>>, vector<8x18xf32>
    %c0_70 = arith.constant 0 : index
    %c160 = arith.constant 160 : index
    %82 = vector.load %arg5[%c0_70, %c160] : memref<8x320xf32, #tpu.memory_space<vmem>>, vector<8x18xf32>
    %c0_71 = arith.constant 0 : index
    %c180 = arith.constant 180 : index
    %83 = vector.load %arg5[%c0_71, %c180] : memref<8x320xf32, #tpu.memory_space<vmem>>, vector<8x18xf32>
    %c0_72 = arith.constant 0 : index
    %c200 = arith.constant 200 : index
    %84 = vector.load %arg5[%c0_72, %c200] : memref<8x320xf32, #tpu.memory_space<vmem>>, vector<8x18xf32>
    %c0_73 = arith.constant 0 : index
    %c220 = arith.constant 220 : index
    %85 = vector.load %arg5[%c0_73, %c220] : memref<8x320xf32, #tpu.memory_space<vmem>>, vector<8x18xf32>
    %c0_74 = arith.constant 0 : index
    %c240 = arith.constant 240 : index
    %86 = vector.load %arg5[%c0_74, %c240] : memref<8x320xf32, #tpu.memory_space<vmem>>, vector<8x18xf32>
    %c0_75 = arith.constant 0 : index
    %c260 = arith.constant 260 : index
    %87 = vector.load %arg5[%c0_75, %c260] : memref<8x320xf32, #tpu.memory_space<vmem>>, vector<8x18xf32>
    %c0_76 = arith.constant 0 : index
    %c280 = arith.constant 280 : index
    %88 = vector.load %arg5[%c0_76, %c280] : memref<8x320xf32, #tpu.memory_space<vmem>>, vector<8x18xf32>
    %c0_77 = arith.constant 0 : index
    %c300 = arith.constant 300 : index
    %89 = vector.load %arg5[%c0_77, %c300] : memref<8x320xf32, #tpu.memory_space<vmem>>, vector<8x18xf32>
    %cst_78 = arith.constant 0.000000e+00 : f32
    %90 = vector.broadcast %cst_78 : f32 to vector<8x18xf32>
    %91 = tpu.concatenate %90, %74, %75, %76, %77, %78, %79, %80, %81, %82, %83, %84, %85, %86, %87, %88 in 1 : vector<8x18xf32>, vector<8x18xf32>, vector<8x18xf32>, vector<8x18xf32>, vector<8x18xf32>, vector<8x18xf32>, vector<8x18xf32>, vector<8x18xf32>, vector<8x18xf32>, vector<8x18xf32>, vector<8x18xf32>, vector<8x18xf32>, vector<8x18xf32>, vector<8x18xf32>, vector<8x18xf32>, vector<8x18xf32> -> vector<8x288xf32>
    %92 = tpu.concatenate %89, %90 in 1 : vector<8x18xf32>, vector<8x18xf32> -> vector<8x36xf32>
    %93 = tpu.concatenate %91, %92 in 1 : vector<8x288xf32>, vector<8x36xf32> -> vector<8x324xf32>
    %c0_79 = arith.constant 0 : index
    %c0_80 = arith.constant 0 : index
    %c0_81 = arith.constant 0 : index
    %94 = vector.load %arg3[%c0_79, %c0_80, %c0_81] : memref<1x8x324xf32, #tpu.memory_space<vmem>>, vector<1x8x324xf32>
    %95 = vector.shape_cast %94 : vector<1x8x324xf32> to vector<8x324xf32>
    %96 = vector.shape_cast %93 : vector<8x324xf32> to vector<1x8x324xf32>
    tpu.vector_store %arg3[%c0_79, %c0_80, %c0_81], %96 {strides = array<i32>} : memref<1x8x324xf32, #tpu.memory_space<vmem>>, vector<1x8x324xf32>,
    %cst_82 = arith.constant dense<0.000000e+00> : vector<8xf32>
    %97 = vector.multi_reduction <add>, %93, %cst_82 [1] : vector<8x324xf32> to vector<8xf32>
    %98 = vector.shape_cast %97 : vector<8xf32> to vector<8x1xf32>
    %99 = arith.mulf %93, %93 : vector<8x324xf32>
    %cst_83 = arith.constant dense<0.000000e+00> : vector<8xf32>
    %100 = vector.multi_reduction <add>, %99, %cst_83 [1] : vector<8x324xf32> to vector<8xf32>
    %101 = vector.shape_cast %100 : vector<8xf32> to vector<8x1xf32>
    %102 = tpu.concatenate %98, %101 in 1 : vector<8x1xf32>, vector<8x1xf32> -> vector<8x2xf32>
    %c0_84 = arith.constant 0 : index
    %c0_85 = arith.constant 0 : index
    %c0_86 = arith.constant 0 : index
    %103 = vector.load %arg4[%c0_84, %c0_85, %c0_86] : memref<1x8x2xf32, #tpu.memory_space<vmem>>, vector<1x8x2xf32>
    %104 = vector.shape_cast %103 : vector<1x8x2xf32> to vector<8x2xf32>
    %105 = vector.shape_cast %102 : vector<8x2xf32> to vector<1x8x2xf32>
    tpu.vector_store %arg4[%c0_84, %c0_85, %c0_86], %105 {strides = array<i32>} : memref<1x8x2xf32, #tpu.memory_space<vmem>>, vector<1x8x2xf32>,
    return
  }
  func.func @transform_0(%arg0: i32) -> (i32, i32, i32) {
    %c0_i32 = arith.constant 0 : i32
    %c0_i32_0 = arith.constant 0 : i32
    %c0_i32_1 = arith.constant 0 : i32
    return %arg0, %c0_i32, %c0_i32_0 : i32, i32, i32
  }
  func.func @transform_1(%arg0: i32) -> (i32, i32, i32) {
    %c0_i32 = arith.constant 0 : i32
    %c0_i32_0 = arith.constant 0 : i32
    %c0_i32_1 = arith.constant 0 : i32
    %c0_i32_2 = arith.constant 0 : i32
    return %c0_i32, %c0_i32_0, %c0_i32_1 : i32, i32, i32
  }
  func.func @transform_2(%arg0: i32) -> (i32, i32, i32) {
    %c0_i32 = arith.constant 0 : i32
    %c0_i32_0 = arith.constant 0 : i32
    %c0_i32_1 = arith.constant 0 : i32
    return %arg0, %c0_i32, %c0_i32_0 : i32, i32, i32
  }
  func.func @transform_3(%arg0: i32) -> (i32, i32, i32) {
    %c0_i32 = arith.constant 0 : i32
    %c0_i32_0 = arith.constant 0 : i32
    %c0_i32_1 = arith.constant 0 : i32
    return %arg0, %c0_i32, %c0_i32_0 : i32, i32, i32
  }
}

module attributes {stable_mosaic.version = 11 : i64} {
  func.func @_bn_apply_kernel(%arg0: i32, %arg1: memref<1x8x324xf32, #tpu.memory_space<vmem>>, %arg2: memref<1x8x1xf32, #tpu.memory_space<vmem>>, %arg3: memref<1x8x1xf32, #tpu.memory_space<vmem>>, %arg4: memref<1x8x324xf32, #tpu.memory_space<vmem>>) attributes {dimension_semantics = [#tpu.dimension_semantics<parallel>], iteration_bounds = array<i64: 2>, scalar_prefetch = 0 : i64, scratch_operands = 0 : i64, tpu.core_type = #tpu.core_type<tc>, window_params = [{transform_indices = @transform_0, window_bounds = array<i64: 1, 8, 324>}, {pipeline_mode = #tpu.pipeline_mode<synchronous>, transform_indices = @transform_1, window_bounds = array<i64: 1, 8, 1>}, {pipeline_mode = #tpu.pipeline_mode<synchronous>, transform_indices = @transform_2, window_bounds = array<i64: 1, 8, 1>}, {transform_indices = @transform_3, window_bounds = array<i64: 1, 8, 324>}]} {
    %c0 = arith.constant 0 : index
    %c0_0 = arith.constant 0 : index
    %c0_1 = arith.constant 0 : index
    %0 = vector.load %arg1[%c0, %c0_0, %c0_1] : memref<1x8x324xf32, #tpu.memory_space<vmem>>, vector<1x8x324xf32>
    %c0_2 = arith.constant 0 : index
    %c0_3 = arith.constant 0 : index
    %c0_4 = arith.constant 0 : index
    %1 = vector.load %arg2[%c0_2, %c0_3, %c0_4] : memref<1x8x1xf32, #tpu.memory_space<vmem>>, vector<1x8x1xf32>
    %2 = vector.broadcast %1 : vector<1x8x1xf32> to vector<1x8x324xf32>
    %3 = arith.mulf %0, %2 : vector<1x8x324xf32>
    %c0_5 = arith.constant 0 : index
    %c0_6 = arith.constant 0 : index
    %c0_7 = arith.constant 0 : index
    %4 = vector.load %arg3[%c0_5, %c0_6, %c0_7] : memref<1x8x1xf32, #tpu.memory_space<vmem>>, vector<1x8x1xf32>
    %5 = vector.broadcast %4 : vector<1x8x1xf32> to vector<1x8x324xf32>
    %6 = arith.addf %3, %5 : vector<1x8x324xf32>
    %c0_8 = arith.constant 0 : index
    %c0_9 = arith.constant 0 : index
    %c0_10 = arith.constant 0 : index
    %7 = vector.load %arg4[%c0_8, %c0_9, %c0_10] : memref<1x8x324xf32, #tpu.memory_space<vmem>>, vector<1x8x324xf32>
    tpu.vector_store %arg4[%c0_8, %c0_9, %c0_10], %6 {strides = array<i32>} : memref<1x8x324xf32, #tpu.memory_space<vmem>>, vector<1x8x324xf32>,
    return
  }
  func.func @transform_0(%arg0: i32) -> (i32, i32, i32) {
    %c0_i32 = arith.constant 0 : i32
    %c0_i32_0 = arith.constant 0 : i32
    %c0_i32_1 = arith.constant 0 : i32
    return %arg0, %c0_i32, %c0_i32_0 : i32, i32, i32
  }
  func.func @transform_1(%arg0: i32) -> (i32, i32, i32) {
    %c0_i32 = arith.constant 0 : i32
    %c0_i32_0 = arith.constant 0 : i32
    %c0_i32_1 = arith.constant 0 : i32
    %c0_i32_2 = arith.constant 0 : i32
    return %c0_i32, %c0_i32_0, %c0_i32_1 : i32, i32, i32
  }
  func.func @transform_2(%arg0: i32) -> (i32, i32, i32) {
    %c0_i32 = arith.constant 0 : i32
    %c0_i32_0 = arith.constant 0 : i32
    %c0_i32_1 = arith.constant 0 : i32
    %c0_i32_2 = arith.constant 0 : i32
    return %c0_i32, %c0_i32_0, %c0_i32_1 : i32, i32, i32
  }
  func.func @transform_3(%arg0: i32) -> (i32, i32, i32) {
    %c0_i32 = arith.constant 0 : i32
    %c0_i32_0 = arith.constant 0 : i32
    %c0_i32_1 = arith.constant 0 : i32
    return %arg0, %c0_i32, %c0_i32_0 : i32, i32, i32
  }
}

</mosaic_0001>

<bundles_post_ra>
// kernel: fac_conv_forward.3
= control target key start
LH: loop header
LB: loop body
LE: loop exit
PB: predicated region body
PF: predicated region fallthrough
CT: control target
= control target key end

     0   :  { %s300_s12 = smov 0   ;;  %s323_s0 = inlined_call_operand.vmem [shape: f32[2,8,324], index: 0, kind: input, shape index: {}, may-alias: {0,3}]   ;;  %s324_s1 = inlined_call_operand.vmem [shape: f32[1,8,1], index: 1, kind: input, shape index: {}]   ;;  %s325_s2 = inlined_call_operand.vmem [shape: f32[1,8,1], index: 2, kind: input, shape index: {}]   ;;  %s326_s3 = inlined_call_operand.vmem [shape: f32[2,8,324], index: 3, kind: output, shape index: {}, may-alias: {0,3}]  }
   0x1 LB: > { %s251_s13 = sadd.s32 4294967295, %s277_s12   ;;  %p255_p0 = scmp.ge.s32.totalorder %s277_s12, 1  ;;  %s277_s12 = sphi %s300_s12, %s13_s12  }
   0x2   : > { %p137_p1 = scmp.lt.s32.totalorder %s277_s12, 3 }
   0x4   : > { %p138_p2 = pnand %p255_p0, %p137_p1 }
   0x5   : > { %p161_p3 = scmp.lt.s32.totalorder (!%p138_p2), %s251_s13, 1 }
   0x6   : > { %141 = sbr.rel (%p138_p2) target bundleno = 141 (0x8d), region = 32 }
   0xb   : > { %v174_v0 = vld [vmem:[%s324_s1] sm:$0xff]  ;;  %v279_v1 = vmov 0   ;;  %s328_s13 = smov (!%p161_p3, %s251_s13), 1  ;;  %vm194_vm0 = vcmask 556032  }
   0xc   : > { %270 = vset.pattern.permute.xlu0 %v279_v1  ;;  %v183_v2 = vld [vmem:[%s325_s2] sm:$0xff]  ;;  %s260_s18 = smul.u32 24, %s328_s13 }
   0xd   : > { %177 = vperm.xlu0 %270, %v174_v0  }
   0xe   : > { %s165_s21 = scalar_lea.vmem %s323_s0, %s260_s18  ;;  %s170_s24 = scalar_lea.vmem %s326_s3, %s260_s18 }
   0xf   : > { %v171_v4 = vld [vmem:[%s165_s21] sm:$0xff]  ;;  %v172_v5 = vld [vmem:[%s165_s21 + $0x8] sm:$0xff]  ;;  %v173_v6 = vld [vmem:[%s165_s21 + $0x10] sm:$0xff] }
  0x15   : > { %186 = vperm.xlu0 %270, %v183_v2  }
  0x7f   : > { %v178_v3 = vpop.permute.xlu0 %177 }
  0x80   : > { %v180_v7 = vmul.f32 %v178_v3, %v171_v4  ;;  %v181_v8 = vmul.f32 %v178_v3, %v172_v5  ;;  %v182_v9 = vmul.f32 %v178_v3, %v173_v6 }
  0x87   : > { %v187_v10 = vpop.permute.xlu0 %186 }
  0x88   : > { %v189_v11 = vadd.f32 %v187_v10, %v180_v7  ;;  %v190_v12 = vadd.f32 %v187_v10, %v181_v8  ;;  %v191_v13 = vadd.f32 %v187_v10, %v182_v9 }
  0x8a   : > { %192 = vst [vmem:[%s170_s24] sm:$0xff] %v189_v11 }
  0x8b   : > { %193 = vst [vmem:[%s170_s24 + $0x8] sm:$0xff] %v190_v12 }
  0x8c   : > { %195 = vst.msk [vmem:[%s170_s24 + $0x10] sm:$0xff] %vm194_vm0, %v191_v13 }
  0x8d PF: > { %s13_s12 = sadd.s32 1, %s277_s12  }
  0x8e   : > { %p10_p4 = scmp.ge.s32.totalorder %s13_s12, 4  }
  0x90   :  { %12 = sbr.rel (!%p10_p4) target bundleno = 1 (0x1), region = 62 }

// kernel: fac_conv_forward.2
= control target key start
LH: loop header
LB: loop body
LE: loop exit
PB: predicated region body
PF: predicated region fallthrough
CT: control target
= control target key end

     0   :  { %s1377_s12 = smov 0   ;;  %s1548_s0 = inlined_call_operand.vmem [shape: f32[2,4,380], index: 0, kind: input, shape index: {}]   ;;  %s1549_s1 = inlined_call_operand.vmem [shape: f32[9,8,4], index: 1, kind: input, shape index: {}]   ;;  %s1550_s2 = inlined_call_operand.vmem [shape: f32[2,8,324], index: 2, kind: output, shape index: {0}]   ;;  %s1551_s3 = inlined_call_operand.vmem [shape: f32[2,8,2], index: 3, kind: output, shape index: {1}]  }
   0x1 LB: > { %s1221_s13 = sadd.s32 4294967295, %s1332_s12   ;;  %p1225_p0 = scmp.ge.s32.totalorder %s1332_s12, 1  ;;  %s1332_s12 = sphi %s1377_s12, %s14_s12  }
   0x2   : > { %p140_p1 = scmp.lt.s32.totalorder %s1332_s12, 3 }
   0x4   : > { %p141_p2 = pnand %p1225_p0, %p140_p1 }
   0x5   : > { %p168_p3 = scmp.lt.s32.totalorder (!%p141_p2), %s1221_s13, 1  ;;  %s1334_s18 = smov (!%p141_p2), 127  }
   0x6   : > { %144 = sbr.rel (%p141_p2) target bundleno = 688 (0x2b0), region = 28  ;;  %s1335_s19 = smov (!%p141_p2), 126  }
   0x7   : > { %s1336_s20 = smov (!%p141_p2), 108   ;;  %s1337_s21 = smov (!%p141_p2), 107  }
   0x8   : > { %s1338_s22 = smov (!%p141_p2), 106   ;;  %s1339_s23 = smov (!%p141_p2), 88  }
   0x9   : > { %s1340_s24 = smov (!%p141_p2), 87   ;;  %s1341_s25 = smov (!%p141_p2), 86  }
   0xa   : > { %s1348_s26 = smov (!%p141_p2), 14   ;;  %s1349_s27 = smov (!%p141_p2), 2  }
   0xb   : > { %s1553_s13 = smov (!%p168_p3, %s1221_s13), 1  ;;  %vm210_vm0 = vcmask 1043456   ;;  %vm206_vm1 = vcmask 31744   ;;  %v186_v45 = vld [vmem:[%s1549_s1] sm:$0xff]  ;;  %vm203_vm2 = vcmask 1039360   ;;  %v1229_v47 = vld [vmem:[%s1549_s1 + $0x8] sm:$0xff] }
   0xc   : > { %s1293_s14 = smul.u32 12, %s1553_s13  ;;  %vm372_vm3 = vcmask 1031168   ;;  %v1242_v56 = vld [vmem:[%s1549_s1 + $0x10] sm:$0xff]  ;;  %vm467_vm4 = vcmask 883712   ;;  %v1249_v62 = vld [vmem:[%s1549_s1 + $0x18] sm:$0xff]  ;;  %vm562_vm5 = vcmask 875520  }
   0xd   : > { %vm657_vm6 = vcmask 867328   ;;  %vm752_vm7 = vcmask 719872   ;;  %vm847_vm8 = vcmask 711680   ;;  %vm942_vm9 = vcmask 703488   ;;  %s1350_s28 = smov 124   ;;  %s1351_s29 = smov 10  }
   0xe   : > { %s1391_s17 = scalar_lea.vmem %s1548_s0, %s1293_s14  ;;  %vm1019_vm10 = vcmask 523264   ;;  %s1352_s30 = smov 8   ;;  %vm1078_vm11 = vcmask 146432   ;;  %vm1080_vm12 = vcmask 293888   ;;  %vm1082_vm13 = vcmask 441344  }
   0xf   : > { %v183_v0 = vld [vmem:[%s1391_s17 + $0x8] sm:$0xf]  ;;  %v922_v1 = vld [vmem:[%s1391_s17] sm:$0xff]  ;;  %s1353_s4 = smov 122   ;;  %s1354_s5 = smov 118   ;;  %vm1084_vm14 = vcmask 588800  }
  0x10   : > { %v185_v2 = vmax.f32 %v183_v0, 0.0  ;;  %v1395_v3 = vmax.f32 %v922_v1, 0.0  ;;  %v353_v7 = vld [vmem:[%s1391_s17 + $0x8] sm:$0xf]  ;;  %s1355_s6 = smov 120   ;;  %s1356_s7 = smov 32  }
  0x11   : > { %v355_v8 = vmax.f32 %v353_v7, 0.0  ;;  %v448_v10 = vld [vmem:[%s1391_s17 + $0x8] sm:$0xf]  ;;  %vm1086_vm15 = vcmask 736256   ;;  %s1228_s11 = sshll.u32 %s1553_s13, 3 }
  0x12   : > { %193 = vst [vmem:[#allocation1 + $0x10] ss:$2 sm:$0xff] %v185_v2  ;;  %v450_v13 = vmax.f32 %v448_v10, 0.0  ;;  %v543_v15 = vld [vmem:[%s1391_s17 + $0x8] sm:$0xf]  ;;  %s181_s16 = scalar_lea.vmem %s1551_s3, %s1228_s11 }
  0x13   : > { %191 = vst [vmem:[#allocation1] ss:$2 sm:$0xff] %v1395_v3  ;;  %v545_v18 = vmax.f32 %v543_v15, 0.0  ;;  %v638_v20 = vld [vmem:[%s1391_s17 + $0x8] sm:$0xf] }
  0x14   : > { %v640_v23 = vmax.f32 %v638_v20, 0.0  ;;  %v733_v25 = vld [vmem:[%s1391_s17 + $0x8] sm:$0xf] }
  0x15   : > { %v735_v28 = vmax.f32 %v733_v25, 0.0  ;;  %v828_v30 = vld [vmem:[%s1391_s17 + $0x8] sm:$0xf] }
  0x16   : > { %v830_v33 = vmax.f32 %v828_v30, 0.0  ;;  %v923_v35 = vld [vmem:[%s1391_s17 + $0x8] sm:$0xf] }
  0x17   : > { %v925_v38 = vmax.f32 %v923_v35, 0.0 }
  0x19   : > { %v196_v4 = vld.sshfl [vmem:[#allocation1 + $0x10] sm:$0xff pattern:$0x75316420] }
  0x1a   : > { %201 = vrot.lane.b32.xlu0 %v196_v4, %s1334_s18  ;;  %279 = vst [vmem:[#allocation1 + $0x10] ss:$2 sm:$0xff] %v185_v2  ;;  %v194_v5 = vld.sshfl [vmem:[#allocation1] sm:$0xff pattern:$0x75316420] }
  0x1b   : > { %v195_v6 = vld.sshfl [vmem:[#allocation1 + $0x8] sm:$0xff pattern:$0x75316420]  ;;  %197 = vrot.lane.b32.xlu1 %v194_v5, %s1334_s18 }
  0x1c   : > { %277 = vst [vmem:[#allocation1] ss:$2 sm:$0xff] %v1395_v3  ;;  %199 = vrot.lane.b32.xlu2 %v195_v6, %s1334_s18 }
  0x21   : > { %v1400_v9 = vld.sshfl [vmem:[#allocation1 + $0x10] sm:$0xff pattern:$0x75316420] }
  0x22   : > { %362 = vst [vmem:[#allocation1 + $0x10] ss:$2 sm:$0xff] %v355_v8  ;;  %v1263_v8 = vld [vmem:[%s1549_s1 + $0x28] sm:$0xff] }
  0x23   : > { %v1403_v11 = vld.sshfl [vmem:[#allocation1] sm:$0xff pattern:$0x75316420]  ;;  %v1405_v12 = vld.sshfl [vmem:[#allocation1 + $0x8] sm:$0xff pattern:$0x75316420] }
  0x24   : > { %360 = vst [vmem:[#allocation1] ss:$2 sm:$0xff] %v1395_v3  ;;  %1236 = vmatpush.msk.msra.mxu3 %vm210_vm0, %v1403_v11 }
  0x25   : > { %1237 = vmatmul.msk.f32.vlgmr.msra.gmra.mxu3 %vm206_vm1, %v186_v45 }
  0x29   : > { %v365_v14 = vld.sshfl [vmem:[#allocation1 + $0x10] sm:$0xff pattern:$0x75316420] }
  0x2a   : > { %457 = vst [vmem:[#allocation1 + $0x10] ss:$2 sm:$0xff] %v450_v13  ;;  %370 = vrot.lane.b32.xlu2 %v365_v14, %s1335_s19  ;;  %v1270_v13 = vld [vmem:[%s1549_s1 + $0x30] sm:$0xff] }
  0x2b   : > { %v363_v16 = vld.sshfl [vmem:[#allocation1] sm:$0xff pattern:$0x75316420]  ;;  %v364_v17 = vld.sshfl [vmem:[#allocation1 + $0x8] sm:$0xff pattern:$0x75316420] }
  0x2c   : > { %366 = vrot.lane.b32.xlu0 %v363_v16, %s1335_s19  ;;  %368 = vrot.lane.b32.xlu1 %v364_v17, %s1335_s19  ;;  %455 = vst [vmem:[#allocation1] ss:$2 sm:$0xff] %v1395_v3 }
  0x31   : > { %v460_v19 = vld.sshfl [vmem:[#allocation1 + $0x10] sm:$0xff pattern:$0x75316420] }
  0x32   : > { %552 = vst [vmem:[#allocation1 + $0x10] ss:$2 sm:$0xff] %v545_v18  ;;  %v1277_v18 = vld [vmem:[%s1549_s1 + $0x38] sm:$0xff] }
  0x33   : > { %v459_v21 = vld.sshfl [vmem:[#allocation1 + $0x8] sm:$0xff pattern:$0x75316420]  ;;  %v458_v22 = vld.sshfl [vmem:[#allocation1] sm:$0xff pattern:$0x75316420] }
  0x34   : > { %463 = vrot.lane.b32.xlu0 %v459_v21, %s1336_s20  ;;  %550 = vst [vmem:[#allocation1] ss:$2 sm:$0xff] %v1395_v3  ;;  %465 = vrot.lane.b32.xlu1 %v460_v19, %s1336_s20 }
  0x35   : > { %461 = vrot.lane.b32.xlu2 %v458_v22, %s1336_s20  ;;  %s1342_s20 = smov 6  }
  0x39   : > { %v555_v24 = vld.sshfl [vmem:[#allocation1 + $0x10] sm:$0xff pattern:$0x75316420] }
  0x3a   : > { %647 = vst [vmem:[#allocation1 + $0x10] ss:$2 sm:$0xff] %v640_v23 }
  0x3b   : > { %v553_v26 = vld.sshfl [vmem:[#allocation1] sm:$0xff pattern:$0x75316420]  ;;  %v554_v27 = vld.sshfl [vmem:[#allocation1 + $0x8] sm:$0xff pattern:$0x75316420] }
  0x3c   : > { %558 = vrot.lane.b32.xlu0 %v554_v27, %s1337_s21  ;;  %645 = vst [vmem:[#allocation1] ss:$2 sm:$0xff] %v1395_v3  ;;  %v1284_v27 = vld [vmem:[%s1549_s1 + $0x40] sm:$0xff] }
  0x3d   : > { %560 = vrot.lane.b32.xlu2 %v555_v24, %s1337_s21 }
  0x41   : > { %v650_v29 = vld.sshfl [vmem:[#allocation1 + $0x10] sm:$0xff pattern:$0x75316420] }
  0x42   : > { %742 = vst [vmem:[#allocation1 + $0x10] ss:$2 sm:$0xff] %v735_v28 }
  0x43   : > { %v649_v31 = vld.sshfl [vmem:[#allocation1 + $0x8] sm:$0xff pattern:$0x75316420]  ;;  %v648_v32 = vld.sshfl [vmem:[#allocation1] sm:$0xff pattern:$0x75316420] }
  0x44   : > { %653 = vrot.lane.b32.xlu1 %v649_v31, %s1338_s22  ;;  %651 = vrot.lane.b32.xlu0 %v648_v32, %s1338_s22  ;;  %740 = vst [vmem:[#allocation1] ss:$2 sm:$0xff] %v1395_v3 }
  0x45   : > { %556 = vrot.lane.b32.xlu2 %v553_v26, %s1337_s21  ;;  %s1343_s21 = smov 84  }
  0x49   : > { %v745_v34 = vld.sshfl [vmem:[#allocation1 + $0x10] sm:$0xff pattern:$0x75316420] }
  0x4a   : > { %837 = vst [vmem:[#allocation1 + $0x10] ss:$2 sm:$0xff] %v830_v33 }
  0x4b   : > { %v744_v36 = vld.sshfl [vmem:[#allocation1 + $0x8] sm:$0xff pattern:$0x75316420]  ;;  %v743_v37 = vld.sshfl [vmem:[#allocation1] sm:$0xff pattern:$0x75316420] }
  0x4c   : > { %748 = vrot.lane.b32.xlu1 %v744_v36, %s1339_s23  ;;  %746 = vrot.lane.b32.xlu0 %v743_v37, %s1339_s23  ;;  %835 = vst [vmem:[#allocation1] ss:$2 sm:$0xff] %v1395_v3 }
  0x51   : > { %v840_v39 = vld.sshfl [vmem:[#allocation1 + $0x10] sm:$0xff pattern:$0x75316420] }
  0x52   : > { %932 = vst [vmem:[#allocation1 + $0x10] ss:$2 sm:$0xff] %v925_v38 }
  0x53   : > { %v838_v40 = vld.sshfl [vmem:[#allocation1] sm:$0xff pattern:$0x75316420]  ;;  %v839_v41 = vld.sshfl [vmem:[#allocation1 + $0x8] sm:$0xff pattern:$0x75316420] }
  0x54   : > { %750 = vrot.lane.b32.xlu1 %v745_v34, %s1339_s23  ;;  %845 = vrot.lane.b32.xlu0 %v840_v39, %s1340_s24  ;;  %930 = vst [vmem:[#allocation1] ss:$2 sm:$0xff] %v1395_v3  ;;  %v1256_v3 = vld [vmem:[%s1549_s1 + $0x20] sm:$0xff]  ;;  %s1345_s23 = smov 4  }
  0x55   : > { %843 = vrot.lane.b32.xlu2 %v839_v41, %s1340_s24 }
  0x59   : > { %v935_v42 = vld.sshfl [vmem:[#allocation1 + $0x10] sm:$0xff pattern:$0x75316420] }
  0x5b   : > { %v933_v43 = vld.sshfl [vmem:[#allocation1] sm:$0xff pattern:$0x75316420]  ;;  %v934_v44 = vld.sshfl [vmem:[#allocation1 + $0x8] sm:$0xff pattern:$0x75316420] }
  0x5c   : > { %655 = vrot.lane.b32.xlu1 %v650_v29, %s1338_s22  ;;  %841 = vrot.lane.b32.xlu0 %v838_v40, %s1340_s24  ;;  %s1344_s22 = smov 16   ;;  %s1346_s24 = smov 18  }
  0x5d   : > { %940 = vrot.lane.b32.xlu2 %v935_v42, %s1341_s25 }
  0x64   : > { %936 = vrot.lane.b32.xlu1 %v933_v43, %s1341_s25 }
  0x65   : > { %938 = vrot.lane.b32.xlu2 %v934_v44, %s1341_s25  ;;  %s1347_s25 = smov 12  }
  0x76   : > { %v200_v46 = vpop.permute.xlu2 %199 }
  0x84   : > { %v371_v51 = vpop.permute.xlu2 %370 }
  0x8c   : > { %v202_v48 = vpop.permute.xlu0 %201 }
  0x8d   : > { %v198_v49 = vpop.permute.xlu1 %197  ;;  %1234 = vmatpush.msk.msra.mxu2 %vm210_vm0, %v202_v48  ;;  %v205_v50 = vsel %vm203_vm2, %v200_v46, %v202_v48 }
  0x8e   : > { %1235 = vmatmul.msk.f32.vlgmr.msra.gmra.mxu2 %vm206_vm1, %v1229_v47  ;;  %1232 = vmatpush.msk.msra.mxu1 %vm210_vm0, %v205_v50  ;;  %v204_v52 = vsel %vm203_vm2, %v198_v49, %v200_v46  ;;  %vm1092_vm2 = vcmask 277504  }
  0x8f   : > { %1230 = vmatpush.msk.msra.mxu0 %vm210_vm0, %v204_v52  ;;  %1233 = vmatmul.msk.f32.vlgmr.msra.gmra.mxu1 %vm206_vm1, %v1229_v47  ;;  %v462_v53 = vpop.permute.xlu2 %461 }
  0x90   : > { %1231 = vmatmul.msk.f32.vlgmr.msra.gmra.mxu0 %vm206_vm1, %v1229_v47  ;;  %1240 = vmatpush.msk.msrb.mxu1 %vm210_vm0, %v1400_v9 }
  0x91   : > { %1238 = vmatpush.msk.msrb.mxu0 %vm210_vm0, %v1405_v12 }
  0x93   : > { %1247 = vmatpush.msk.msra.mxu0 %vm210_vm0, %v371_v51 }
  0x97   : > { %1241 = vmatmul.msk.f32.vlgmr.msrb.gmra.mxu1 %vm206_vm1, %v186_v45  ;;  %v561_v59 = vpop.permute.xlu2 %560 }
  0x98   : > { %1239 = vmatmul.msk.f32.vlgmr.msrb.gmra.mxu0 %vm206_vm1, %v186_v45 }
  0x9e   : > { %v367_v54 = vpop.permute.xlu0 %366  ;;  %v369_v55 = vpop.permute.xlu1 %368 }
  0x9f   : > { %v373_v57 = vsel %vm372_vm3, %v367_v54, %v369_v55  ;;  %v374_v58 = vsel %vm372_vm3, %v369_v55, %v371_v51  ;;  %v557_v1 = vpop.permute.xlu2 %556 }
  0xa0   : > { %1243 = vmatpush.msk.msrb.mxu2 %vm210_vm0, %v373_v57  ;;  %1245 = vmatpush.msk.msrb.mxu3 %vm210_vm0, %v374_v58 }
  0xa1   : > { %1244 = vmatmul.msk.f32.vlgmr.msrb.gmra.mxu2 %vm206_vm1, %v1242_v56  ;;  %1246 = vmatmul.msk.f32.vlgmr.msrb.gmra.mxu3 %vm206_vm1, %v1242_v56 }
  0xa2   : > { %1248 = vmatmul.msk.f32.vlgmr.msra.gmra.mxu0 %vm206_vm1, %v1242_v56 }
  0xa6   : > { %v464_v60 = vpop.permute.xlu0 %463  ;;  %v466_v61 = vpop.permute.xlu1 %465 }
  0xa7   : > { %v468_v63 = vsel %vm467_vm4, %v462_v53, %v464_v60  ;;  %v469_v0 = vsel %vm467_vm4, %v464_v60, %v466_v61  ;;  %1254 = vmatpush.msk.msra.mxu3 %vm210_vm0, %v466_v61 }
  0xa8   : > { %1252 = vmatpush.msk.msra.mxu2 %vm210_vm0, %v469_v0  ;;  %1250 = vmatpush.msk.msra.mxu1 %vm210_vm0, %v468_v63  ;;  %v309_v33 = vpop.f32.mrf.mxu3 }
  0xa9   : > { %1253 = vmatmul.msk.f32.vlgmr.msra.gmra.mxu2 %vm206_vm1, %v1249_v62  ;;  %1255 = vmatmul.msk.f32.vlgmr.msra.gmra.mxu3 %vm206_vm1, %v1249_v62 }
  0xaa   : > { %1261 = vmatpush.msk.msrb.mxu2 %vm210_vm0, %v561_v59  ;;  %1251 = vmatmul.msk.f32.vlgmr.msra.gmra.mxu1 %vm206_vm1, %v1249_v62 }
  0xae   : > { %v559_v2 = vpop.permute.xlu0 %558 }
  0xaf   : > { %v564_v4 = vsel %vm562_vm5, %v559_v2, %v561_v59  ;;  %v563_v5 = vsel %vm562_vm5, %v557_v1, %v559_v2  ;;  %v844_v10 = vpop.permute.xlu2 %843  ;;  %vm1094_vm5 = vcmask 424960  }
  0xb0   : > { %1257 = vmatpush.msk.msrb.mxu0 %vm210_vm0, %v563_v5  ;;  %1259 = vmatpush.msk.msrb.mxu1 %vm210_vm0, %v564_v4 }
  0xb1   : > { %1262 = vmatmul.msk.f32.vlgmr.msrb.gmra.mxu2 %vm206_vm1, %v1256_v3  ;;  %1258 = vmatmul.msk.f32.vlgmr.msrb.gmra.mxu0 %vm206_vm1, %v1256_v3 }
  0xb2   : > { %1260 = vmatmul.msk.f32.vlgmr.msrb.gmra.mxu1 %vm206_vm1, %v1256_v3 }
  0xb6   : > { %v654_v6 = vpop.permute.xlu1 %653  ;;  %v652_v7 = vpop.permute.xlu0 %651 }
  0xb7   : > { %v658_v9 = vsel %vm657_vm6, %v652_v7, %v654_v6  ;;  %v941_v15 = vpop.permute.xlu2 %940 }
  0xb8   : > { %1264 = vmatpush.msk.msrb.mxu3 %vm210_vm0, %v658_v9 }
  0xb9   : > { %1265 = vmatmul.msk.f32.vlgmr.msrb.gmra.mxu3 %vm206_vm1, %v1263_v8 }
  0xbe   : > { %v749_v11 = vpop.permute.xlu1 %748  ;;  %v747_v12 = vpop.permute.xlu0 %746 }
  0xbf   : > { %v753_v14 = vsel %vm752_vm7, %v747_v12, %v749_v11  ;;  %v939_v21 = vpop.permute.xlu2 %938 }
  0xc0   : > { %1271 = vmatpush.msk.msra.mxu2 %vm210_vm0, %v753_v14  ;;  %v944_v26 = vsel %vm942_vm9, %v939_v21, %v941_v15 }
  0xc1   : > { %1272 = vmatmul.msk.f32.vlgmr.msra.gmra.mxu2 %vm206_vm1, %v1270_v13 }
  0xc6   : > { %v751_v16 = vpop.permute.xlu1 %750  ;;  %v846_v17 = vpop.permute.xlu0 %845 }
  0xc7   : > { %v754_v19 = vsel %vm752_vm7, %v749_v11, %v751_v16  ;;  %v849_v20 = vsel %vm847_vm8, %v844_v10, %v846_v17 }
  0xc8   : > { %1273 = vmatpush.msk.msra.mxu3 %vm210_vm0, %v754_v19  ;;  %1280 = vmatpush.msk.msrb.mxu2 %vm210_vm0, %v849_v20 }
  0xc9   : > { %1274 = vmatmul.msk.f32.vlgmr.msra.gmra.mxu3 %vm206_vm1, %v1270_v13  ;;  %1281 = vmatmul.msk.f32.vlgmr.msrb.gmra.mxu2 %vm206_vm1, %v1277_v18 }
  0xca   : > { %1282 = vmatpush.msk.msrb.mxu3 %vm210_vm0, %v846_v17  ;;  %1289 = vmatpush.msk.msra.mxu2 %vm210_vm0, %v941_v15 }
  0xce   : > { %v656_v22 = vpop.permute.xlu1 %655  ;;  %v842_v23 = vpop.permute.xlu0 %841 }
  0xcf   : > { %v659_v24 = vsel %vm657_vm6, %v654_v6, %v656_v22  ;;  %v848_v25 = vsel %vm847_vm8, %v842_v23, %v844_v10  ;;  %1268 = vmatpush.msk.msra.mxu1 %vm210_vm0, %v656_v22  ;;  %vm1096_vm8 = vcmask 572416  }
  0xd0   : > { %1266 = vmatpush.msk.msra.mxu0 %vm210_vm0, %v659_v24  ;;  %1269 = vmatmul.msk.f32.vlgmr.msra.gmra.mxu1 %vm206_vm1, %v1263_v8 }
  0xd1   : > { %1278 = vmatpush.msk.msrb.mxu1 %vm210_vm0, %v848_v25  ;;  %1267 = vmatmul.msk.f32.vlgmr.msra.gmra.mxu0 %vm206_vm1, %v1263_v8 }
  0xd2   : > { %1275 = vmatpush.msk.msrb.mxu0 %vm210_vm0, %v751_v16  ;;  %1283 = vmatmul.msk.f32.vlgmr.msrb.gmra.mxu3 %vm206_vm1, %v1277_v18 }
  0xd3   : > { %1287 = vmatpush.msk.msra.mxu1 %vm210_vm0, %v944_v26  ;;  %1290 = vmatmul.msk.f32.vlgmr.msra.gmra.mxu2 %vm206_vm1, %v1284_v27 }
  0xd6   : > { %v937_v28 = vpop.permute.xlu1 %936 }
  0xd7   : > { %v943_v29 = vsel %vm942_vm9, %v937_v28, %v939_v21  ;;  %vm1069_vm9 = vcmask 998400  }
  0xd8   : > { %1279 = vmatmul.msk.f32.vlgmr.msrb.gmra.mxu1 %vm206_vm1, %v1277_v18  ;;  %1285 = vmatpush.msk.msra.mxu0 %vm210_vm0, %v943_v29  ;;  %vm1048_vm0 = vcmask 48128  }
  0xd9   : > { %1276 = vmatmul.msk.f32.vlgmr.msrb.gmra.mxu0 %vm206_vm1, %v1270_v13 }
  0xe0   : > { %1288 = vmatmul.msk.f32.vlgmr.msra.gmra.mxu1 %vm206_vm1, %v1284_v27 }
  0xe1   : > { %1286 = vmatmul.msk.f32.vlgmr.msra.gmra.mxu0 %vm206_vm1, %v1284_v27  ;;  %vm1090_vm1 = vcmask 130048  }
 0x10c   : > { %v254_v31 = vpop.f32.mrf.mxu1 }
 0x10d   : > { %v234_v32 = vpop.f32.mrf.mxu0 }
 0x10e   : > { %v310_v50 = vadd.f32 %v309_v33, %v234_v32 }
 0x111   : > { %v274_v30 = vpop.f32.mrf.mxu2 }
 0x114   : > { %v349_v35 = vpop.f32.mrf.mxu1 }
 0x115   : > { %v329_v36 = vpop.f32.mrf.mxu0  ;;  %v350_v48 = vadd.f32 %v349_v35, %v274_v30 }
 0x116   : > { %v330_v45 = vadd.f32 %v329_v36, %v254_v31 }
 0x11f   : > { %v441_v40 = vpop.f32.mrf.mxu0 }
 0x120   : > { %v446_v52 = vadd.f32 %v441_v40, %v350_v48 }
 0x124   : > { %v401_v34 = vpop.f32.mrf.mxu2  ;;  %v421_v37 = vpop.f32.mrf.mxu3 }
 0x125   : > { %v445_v49 = vadd.f32 %v421_v37, %v330_v45  ;;  %v444_v57 = vadd.f32 %v401_v34, %v310_v50 }
 0x127   : > { %v496_v39 = vpop.f32.mrf.mxu1 }
 0x128   : > { %v539_v61 = vadd.f32 %v496_v39, %v444_v57 }
 0x12c   : > { %v516_v38 = vpop.f32.mrf.mxu2  ;;  %v536_v41 = vpop.f32.mrf.mxu3 }
 0x12d   : > { %v540_v54 = vadd.f32 %v516_v38, %v445_v49  ;;  %v541_v58 = vadd.f32 %v536_v41, %v446_v52 }
 0x12e   : > { %v591_v46 = vpop.f32.mrf.mxu0 }
 0x12f   : > { %v611_v44 = vpop.f32.mrf.mxu1  ;;  %v634_v3 = vadd.f32 %v591_v46, %v539_v61 }
 0x130   : > { %v635_v59 = vadd.f32 %v611_v44, %v540_v54 }
 0x134   : > { %v631_v42 = vpop.f32.mrf.mxu2 }
 0x135   : > { %v636_v60 = vadd.f32 %v631_v42, %v541_v58 }
 0x13c   : > { %v686_v43 = vpop.f32.mrf.mxu3 }
 0x13d   : > { %v729_v7 = vadd.f32 %v686_v43, %v634_v3 }
 0x144   : > { %v781_v47 = vpop.f32.mrf.mxu2 }
 0x145   : > { %v824_v9 = vadd.f32 %v781_v47, %v729_v7 }
 0x14c   : > { %v801_v51 = vpop.f32.mrf.mxu3  ;;  %v896_v56 = vpop.f32.mrf.mxu2 }
 0x14d   : > { %v726_v53 = vpop.f32.mrf.mxu1 }
 0x14e   : > { %v706_v55 = vpop.f32.mrf.mxu0  ;;  %v731_v63 = vadd.f32 %v726_v53, %v636_v60 }
 0x14f   : > { %v730_v62 = vadd.f32 %v706_v55, %v635_v59 }
 0x151   : > { %v825_v5 = vadd.f32 %v801_v51, %v730_v62 }
 0x153   : > { %v920_v11 = vadd.f32 %v896_v56, %v825_v5 }
 0x155   : > { %v876_v0 = vpop.f32.mrf.mxu1  ;;  %v916_v2 = vpop.f32.mrf.mxu3 }
 0x156   : > { %v821_v1 = vpop.f32.mrf.mxu0  ;;  %v1011_v6 = vpop.f32.mrf.mxu2  ;;  %v919_v12 = vadd.f32 %v876_v0, %v824_v9 }
 0x157   : > { %v826_v4 = vadd.f32 %v821_v1, %v731_v63 }
 0x159   : > { %v921_v8 = vadd.f32 %v916_v2, %v826_v4 }
 0x15b   : > { %v1016_v10 = vadd.f32 %v1011_v6, %v921_v8 }
 0x15d   : > { %1020 = vst.msk [vmem:[#allocation2 + $0x10] sm:$0xff] %vm1019_vm10, %v1016_v10  ;;  %v991_v13 = vpop.f32.mrf.mxu1  ;;  %vm1112_vm10 = vcmask 261120  }
 0x15e   : > { %v1518_v14 = vadd.f32 %v991_v13, %v920_v11  ;;  %v971_v15 = vpop.f32.mrf.mxu0 }
 0x15f   : > { %v1014_v16 = vadd.f32 %v971_v15, %v919_v12 }
 0x160   : > { %1046 = vrot.lane.b32.xlu2 %v1518_v14, %s1342_s20 }
 0x161   : > { %1044 = vrot.lane.b32.xlu1 %v1014_v16, %s1342_s20 }
 0x164   : > { %v1023_v17 = vld [vmem:[#allocation2 + $0x10] sm:$0xff] }
 0x165   : > { %1104 = vrot.lane.b32.xlu0 %v1023_v17, %s1343_s21 }
 0x168   : > { %1028 = vrot.lane.b32.xlu2 %v1014_v16, %s1344_s22 }
 0x169   : > { %1052 = vrot.lane.b32.xlu1 %v1518_v14, %s1345_s23 }
 0x16d   : > { %1025 = vrot.lane.b32.xlu0 %v1014_v16, %s1346_s24 }
 0x170   : > { %1034 = vrot.lane.b32.xlu2 %v1014_v16, %s1347_s25 }
 0x171   : > { %1031 = vrot.lane.b32.xlu1 %v1014_v16, %s1348_s26 }
 0x175   : > { %1055 = vrot.lane.b32.xlu0 %v1518_v14, %s1349_s27 }
 0x178   : > { %1061 = vrot.lane.b32.xlu2 %v1518_v14, %s1350_s28 }
 0x179   : > { %1037 = vrot.lane.b32.xlu1 %v1014_v16, %s1351_s29 }
 0x17d   : > { %1058 = vrot.lane.b32.xlu0 %v1518_v14, %s1335_s19  ;;  %s1294_s19 = smul.u32 24, %s1553_s13 }
 0x17f   : > { %s1531_s10 = scalar_lea.vmem %s1550_s2, %s1294_s19 }
 0x180   : > { %1040 = vrot.lane.b32.xlu2 %v1014_v16, %s1352_s30 }
 0x181   : > { %1067 = vrot.lane.b32.xlu1 %v1023_v17, %s1353_s4 }
 0x185   : > { %1065 = vrot.lane.b32.xlu0 %v1518_v14, %s1353_s4 }
 0x189   : > { %1075 = vrot.lane.b32.xlu1 %v1023_v17, %s1354_s5 }
 0x18d   : > { %1072 = vrot.lane.b32.xlu0 %v1023_v17, %s1355_s6 }
 0x1ba   : > { %v1047_v18 = vpop.permute.xlu2 %1046 }
 0x1c2   : > { %v1029_v19 = vpop.permute.xlu2 %1028 }
 0x1ca   : > { %v1035_v22 = vpop.permute.xlu2 %1034 }
 0x1d2   : > { %v1062_v26 = vpop.permute.xlu2 %1061 }
 0x1d3   : > { %v1045_v20 = vpop.permute.xlu1 %1044 }
 0x1d4   : > { %v1049_v39 = vsel %vm1048_vm0, %v1045_v20, %v1047_v18 }
 0x1d7   : > { %v1105_v21 = vpop.permute.xlu0 %1104 }
 0x1d8   : > { %v1107_v23 = vsel %vm1078_vm11, %v1105_v21, 0.0 }
 0x1d9   : > { %1109 = vrot.lane.b32.xlu2 %v1107_v23, %s1356_s7 }
 0x1da   : > { %v1041_v34 = vpop.permute.xlu2 %1040 }
 0x1db   : > { %v1053_v24 = vpop.permute.xlu1 %1052 }
 0x1dc   : > { %v1091_v40 = vsel %vm1090_vm1, %v1049_v39, %v1053_v24 }
 0x1df   : > { %v1026_v25 = vpop.permute.xlu0 %1025 }
 0x1e0   : > { %v1079_v28 = vsel %vm1078_vm11, 0.0, %v1026_v25  ;;  %vm1116_vm11 = vcmask 556032  }
 0x1e1   : > { %v1081_v29 = vsel %vm1080_vm12, %v1079_v28, %v1029_v19 }
 0x1e3   : > { %v1032_v27 = vpop.permute.xlu1 %1031 }
 0x1e4   : > { %v1083_v31 = vsel %vm1082_vm13, %v1081_v29, %v1032_v27 }
 0x1e5   : > { %v1085_v32 = vsel %vm1084_vm14, %v1083_v31, %v1035_v22 }
 0x1e7   : > { %v1056_v30 = vpop.permute.xlu0 %1055 }
 0x1e8   : > { %v1093_v41 = vsel %vm1092_vm2, %v1091_v40, %v1056_v30 }
 0x1e9   : > { %v1095_v43 = vsel %vm1094_vm5, %v1093_v41, %v1518_v14 }
 0x1eb   : > { %v1038_v33 = vpop.permute.xlu1 %1037 }
 0x1ec   : > { %v1087_v35 = vsel %vm1086_vm15, %v1085_v32, %v1038_v33 }
 0x1ed   : > { %v1088_v36 = vsel %vm467_vm4, %v1087_v35, %v1041_v34  ;;  %vm1100_vm4 = vcmask 1014784  }
 0x1ee   : > { %v1089_v37 = vsel %vm372_vm3, %v1088_v36, %v1045_v20  ;;  %vm1102_vm3 = vcmask 113664  }
 0x1ef   : > { %v1059_v38 = vpop.permute.xlu0 %1058  ;;  %1114 = vst [vmem:[%s1531_s10] sm:$0xff] %v1089_v37  ;;  %v1123_v57 = vmul.f32 %v1089_v37, %v1089_v37 }
 0x1f0   : > { %v1097_v44 = vsel %vm1096_vm8, %v1095_v43, %v1059_v38 }
 0x1f1   : > { %v1098_v47 = vsel %vm752_vm7, %v1097_v44, %v1062_v26  ;;  %vm1133_vm7 = vcmask 15360  }
 0x1f3   : > { %v1068_v45 = vpop.permute.xlu1 %1067 }
 0x1f7   : > { %v1066_v42 = vpop.permute.xlu0 %1065 }
 0x1f8   : > { %v1070_v46 = vsel %vm1069_vm9, %v1066_v42, %v1068_v45 }
 0x1f9   : > { %v1099_v49 = vsel %vm657_vm6, %v1098_v47, %v1070_v46  ;;  %vm1131_vm6 = vcmask 7168  }
 0x1fb   : > { %v1076_v52 = vpop.permute.xlu1 %1075 }
 0x1ff   : > { %v1073_v48 = vpop.permute.xlu0 %1072 }
 0x200   : > { %v1101_v50 = vsel %vm1100_vm4, %v1099_v49, %v1073_v48  ;;  %v1103_v53 = vsel %vm1102_vm3, %v1073_v48, %v1076_v52 }
 0x201   : > { %1115 = vst [vmem:[%s1531_s10 + $0x8] sm:$0xff] %v1101_v50  ;;  %v1124_v51 = vmul.f32 %v1101_v50, %v1101_v50  ;;  %v1118_v56 = vadd.f32 %v1101_v50, %v1089_v37 }
 0x203   : > { %v1126_v61 = vadd.f32 %v1124_v51, %v1123_v57 }
 0x233   : > { %v1110_v54 = vpop.permute.xlu2 %1109 }
 0x234   : > { %v1113_v55 = vsel %vm1112_vm10, %v1103_v53, %v1110_v54 }
 0x235   : > { %1117 = vst.msk [vmem:[%s1531_s10 + $0x10] sm:$0xff] %vm1116_vm11, %v1113_v55  ;;  %v1125_v58 = vmul.f32 %v1113_v55, %v1113_v55  ;;  %v1119_v59 = vsel %vm1116_vm11, %v1113_v55, 0.0 }
 0x236   : > { %v1120_v60 = vadd.f32 %v1119_v59, %v1118_v56 }
 0x237   : > { %v1127_v62 = vsel %vm1116_vm11, %v1125_v58, 0.0 }
 0x238   : > { %1121 = vadd.xlane.f32.xlu0 %v1120_v60  ;;  %v1128_v63 = vadd.f32 %v1127_v62, %v1126_v61 }
 0x23a   : > { %1129 = vadd.xlane.f32.xlu1 %v1128_v63 }
 0x2ab   : > { %v1122_v0 = vpop.xlane.xlu0 %1121 }
 0x2ad   : > { %v1130_v1 = vpop.xlane.xlu1 %1129 }
 0x2ae   : > { %v1132_v2 = vsel %vm1131_vm6, %v1122_v0, %v1130_v1 }
 0x2af   : > { %1134 = vst.msk [vmem:[%s181_s16] sm:$0xff] %vm1133_vm7, %v1132_v2 }
 0x2b0 PF: > { %s14_s12 = sadd.s32 1, %s1332_s12  }
 0x2b1   : > { %p11_p4 = scmp.ge.s32.totalorder %s14_s12, 4  }
 0x2b3   :  { %13 = sbr.rel (!%p11_p4) target bundleno = 1 (0x1), region = 87 }

</bundles_post_ra>
